<compile_context>
chip_gen: v7x
topology: tpu7x:2x2x1
jax: 0.10.0
libtpu: 0.0.40
codegen_flags: <defaults>
</compile_context>

<pallas_src>
import jax
import jax.numpy as jnp
import numpy as np
from jax import lax
from jax.experimental import pallas as pl
from jax.experimental.pallas import tpu as pltpu


def char_decoder_kernel(xg_ref, whh_ref, wout_ref, bout_ref, h0_ref, c0_ref,
                        scores_ref, hN_ref, cN_ref,
                        h_all):
    """Whole sequence in one invocation: recurrence + batched output projection.

    xg_ref:   (L, Bp, 4H)  precomputed x @ W_ih^T + b  (gathered per char id)
    whh_ref:  (H, 4H)      recurrent weight (pre-transposed)
    wout_ref: (H, Vp)      output projection (pre-transposed, lane-padded)
    bout_ref: (1, Vp)
    h0/c0:    (Bp, H)
    scores:   (L*Bp, Vp)   lane-dense slab, reshaped/sliced in the wrapper
    hN/cN:    (Bp, H)
    h_all:    (L*Bp, H)    VMEM scratch holding every h_t for the batched matmul
    """
    L, Bp, _ = xg_ref.shape
    H = whh_ref.shape[0]

    whh = whh_ref[...]          # hoist loop-invariant weight load out of the loop

    def step(t, carry):
        h, c = carry
        # gates = x_t @ W_ih^T + b  (precomputed, gathered)  +  h @ W_hh^T
        gates = xg_ref[t] + jnp.dot(h, whh, preferred_element_type=jnp.float32)
        # PyTorch LSTM gate order: i, f, g, o
        i_g = jax.nn.sigmoid(gates[:, 0 * H:1 * H])
        f_g = jax.nn.sigmoid(gates[:, 1 * H:2 * H])
        g_g = jnp.tanh(gates[:, 2 * H:3 * H])
        o_g = jax.nn.sigmoid(gates[:, 3 * H:4 * H])
        c_new = f_g * c + i_g * g_g
        h_new = o_g * jnp.tanh(c_new)
        h_all[pl.ds(t * Bp, Bp), :] = h_new
        return h_new, c_new

    h_fin, c_fin = lax.fori_loop(0, L, step, (h0_ref[...], c0_ref[...]),
                                 unroll=True)

    hN_ref[...] = h_fin
    cN_ref[...] = c_fin

    # Batched char_output_projection over all L*Bp rows at once (lane-dense store).
    scores_ref[...] = (jnp.dot(h_all[...], wout_ref[...],
                               preferred_element_type=jnp.float32)
                       + bout_ref[...]).astype(scores_ref.dtype)


def char_decoder_forward(input_ids, params, dec_hidden=None):
    """Pallas implementation of CharDecoder.forward.

    input_ids: int32 (L, B)
    params: dict with emb (V, E), w_ih_T (E, 4H), w_hh_T (H, 4H), b (1, 4H),
            w_out_T (H, V), b_out (1, V)
    dec_hidden: optional tuple of (1, B, H) tensors
    returns: scores (L, B, V), (h_n, c_n) each (1, B, H)
    """
    L, B = input_ids.shape
    H = params["w_hh_T"].shape[0]
    V = params["w_out_T"].shape[1]

    Bp = ((max(B, 8) + 7) // 8) * 8        # pad batch to a full sublane group
    Vp = ((V + 127) // 128) * 128          # pad vocab to a full lane group

    # Fold embedding lookup + input matmul + bias into a single gathered table:
    #   xg_table[v] = emb[v] @ W_ih^T + (b_ih + b_hh)        (V, 4H)
    # The gather itself stays in XLA glue (tiny, data-dependent).
    xg_table = (jnp.dot(params["emb"], params["w_ih_T"],
                        preferred_element_type=jnp.float32) + params["b"])
    xg = xg_table[input_ids]                               # (L, B, 4H)
    xg = jnp.pad(xg, ((0, 0), (0, Bp - B), (0, 0)))        # (L, Bp, 4H)

    if dec_hidden is None:
        h0 = jnp.zeros((Bp, H), jnp.float32)
        c0 = jnp.zeros((Bp, H), jnp.float32)
    else:
        h0 = jnp.pad(dec_hidden[0].reshape(B, H).astype(jnp.float32),
                     ((0, Bp - B), (0, 0)))
        c0 = jnp.pad(dec_hidden[1].reshape(B, H).astype(jnp.float32),
                     ((0, Bp - B), (0, 0)))

    wout = jnp.pad(params["w_out_T"].astype(jnp.float32),
                   ((0, 0), (0, Vp - V)))                  # (H, Vp)
    bout = jnp.pad(params["b_out"].astype(jnp.float32),
                   ((0, 0), (0, Vp - V)))                  # (1, Vp)

    def full(shape):
        n = len(shape)
        return pl.BlockSpec(shape, lambda i, _n=n: (0,) * _n)

    scores2d, h_n, c_n = pl.pallas_call(
        char_decoder_kernel,
        out_shape=(
            jax.ShapeDtypeStruct((L * Bp, Vp), jnp.float32),
            jax.ShapeDtypeStruct((Bp, H), jnp.float32),
            jax.ShapeDtypeStruct((Bp, H), jnp.float32),
        ),
        grid_spec=pltpu.PrefetchScalarGridSpec(
            num_scalar_prefetch=0,
            grid=(1,),                                     # single invocation
            in_specs=[
                full((L, Bp, 4 * H)),                      # xg
                full((H, 4 * H)),                          # W_hh^T
                full((H, Vp)),                             # W_out^T (padded)
                full((1, Vp)),                             # b_out   (padded)
                full((Bp, H)),                             # h0
                full((Bp, H)),                             # c0
            ],
            out_specs=[
                full((L * Bp, Vp)),                        # scores slab
                full((Bp, H)),                             # h_n
                full((Bp, H)),                             # c_n
            ],
            scratch_shapes=[
                pltpu.VMEM((L * Bp, H), jnp.float32),      # all h_t for batched proj
            ],
        ),
        compiler_params=pltpu.CompilerParams(
            dimension_semantics=("arbitrary",)),
        # TODO(synk): for large batches on v7x, add a leading "parallel" grid
        # axis over batch tiles so both TensorCores run independent shards.
    )(xg, params["w_hh_T"], wout, bout, h0, c0)

    scores = scores2d.reshape(L, Bp, Vp)[:, :B, :V]
    return scores, (h_n[:B].reshape(1, B, H), c_n[:B].reshape(1, B, H))


def char_decoder_reference(input_ids, params, dec_hidden=None):
    """Pure-JAX reference (lax.scan) matching PyTorch nn.LSTM semantics."""
    L, B = input_ids.shape
    H = params["w_hh_T"].shape[0]
    x = params["emb"][input_ids]
    if dec_hidden is None:
        h0 = jnp.zeros((B, H), jnp.float32)
        c0 = jnp.zeros((B, H), jnp.float32)
    else:
        h0, c0 = dec_hidden[0].reshape(B, H), dec_hidden[1].reshape(B, H)

    def step(carry, x_t):
        h, c = carry
        gates = x_t @ params["w_ih_T"] + h @ params["w_hh_T"] + params["b"][0]
        i, f, g, o = jnp.split(gates, 4, axis=-1)
        c_new = jax.nn.sigmoid(f) * c + jax.nn.sigmoid(i) * jnp.tanh(g)
        h_new = jax.nn.sigmoid(o) * jnp.tanh(c_new)
        s = h_new @ params["w_out_T"] + params["b_out"][0]
        return (h_new, c_new), s

    (h_n, c_n), scores = lax.scan(step, (h0, c0), x)
    return scores, (h_n.reshape(1, B, H), c_n.reshape(1, B, H))


def init_params(key, vocab_size, char_embedding_size, hidden_size, pad_idx=0):
    ks = jax.random.split(key, 6)
    E, H, V = char_embedding_size, hidden_size, vocab_size
    scale = 0.1
    emb = scale * jax.random.normal(ks[0], (V, E), jnp.float32)
    emb = emb.at[pad_idx].set(0.0)                   # padding_idx row is zero
    w_ih = scale * jax.random.normal(ks[1], (4 * H, E), jnp.float32)
    w_hh = scale * jax.random.normal(ks[2], (4 * H, H), jnp.float32)
    b_ih = scale * jax.random.normal(ks[3], (4 * H,), jnp.float32)
    b_hh = scale * jax.random.normal(ks[4], (4 * H,), jnp.float32)
    w_out = scale * jax.random.normal(ks[5], (V, H), jnp.float32)
    b_out = jnp.zeros((V,), jnp.float32)
    return {
        "emb": emb,
        "w_ih_T": w_ih.T,                            # (E, 4H)
        "w_hh_T": w_hh.T,                            # (H, 4H)
        "b": (b_ih + b_hh).reshape(1, 4 * H),        # (1, 4H)
        "w_out_T": w_out.T,                          # (H, V)
        "b_out": b_out.reshape(1, V),                # (1, V)
    }


if __name__ == "__main__":
    # Small shapes consistent with CharDecoder: char vocab ~30, emb 50, hidden 32.
    L, B = 8, 4
    VOCAB, EMB, HID = 30, 50, 32

    key = jax.random.PRNGKey(0)
    k_param, k_ids, k_h, k_c = jax.random.split(key, 4)
    params = init_params(k_param, VOCAB, EMB, HID, pad_idx=0)

    input_ids = jax.random.randint(k_ids, (L, B), 0, VOCAB, dtype=jnp.int32)
    dec_hidden = (0.1 * jax.random.normal(k_h, (1, B, HID), jnp.float32),
                  0.1 * jax.random.normal(k_c, (1, B, HID), jnp.float32))

    scores, (h_n, c_n) = char_decoder_forward(input_ids, params, dec_hidden)
    jax.block_until_ready((scores, h_n, c_n))

    ref_scores, (ref_h, ref_c) = char_decoder_reference(input_ids, params, dec_hidden)
    np.testing.assert_allclose(np.asarray(scores), np.asarray(ref_scores),
                               rtol=1e-4, atol=1e-4)
    np.testing.assert_allclose(np.asarray(h_n), np.asarray(ref_h), rtol=1e-4, atol=1e-4)
    np.testing.assert_allclose(np.asarray(c_n), np.asarray(ref_c), rtol=1e-4, atol=1e-4)

    # Also check the dec_hidden=None path (as used at the start of decoding).
    s2, (h2, c2) = char_decoder_forward(input_ids, params, None)
    r2, (rh2, rc2) = char_decoder_reference(input_ids, params, None)
    jax.block_until_ready((s2, h2, c2))
    np.testing.assert_allclose(np.asarray(s2), np.asarray(r2), rtol=1e-4, atol=1e-4)
    np.testing.assert_allclose(np.asarray(h2), np.asarray(rh2), rtol=1e-4, atol=1e-4)
    np.testing.assert_allclose(np.asarray(c2), np.asarray(rc2), rtol=1e-4, atol=1e-4)

    assert scores.shape == (L, B, VOCAB)
    assert h_n.shape == (1, B, HID) and c_n.shape == (1, B, HID)
    print("KERNEL_OK")
</pallas_src>

<mosaic_0001>
module attributes {stable_mosaic.version = 11 : i64} {
  func.func @char_decoder_kernel(%arg0: i32, %arg1: memref<8x8x128xf32, #tpu.memory_space<vmem>>, %arg2: memref<32x128xf32, #tpu.memory_space<vmem>>, %arg3: memref<32x128xf32, #tpu.memory_space<vmem>>, %arg4: memref<1x128xf32, #tpu.memory_space<vmem>>, %arg5: memref<8x32xf32, #tpu.memory_space<vmem>>, %arg6: memref<8x32xf32, #tpu.memory_space<vmem>>, %arg7: memref<64x128xf32, #tpu.memory_space<vmem>>, %arg8: memref<8x32xf32, #tpu.memory_space<vmem>>, %arg9: memref<8x32xf32, #tpu.memory_space<vmem>>, %arg10: memref<64x32xf32, #tpu.memory_space<vmem>>) attributes {dimension_semantics = [#tpu.dimension_semantics<arbitrary>], iteration_bounds = array<i64: 1>, scalar_prefetch = 0 : i64, scratch_operands = 1 : i64, tpu.core_type = #tpu.core_type<tc>, window_params = [{pipeline_mode = #tpu.pipeline_mode<synchronous>, transform_indices = @transform_0, window_bounds = array<i64: 8, 8, 128>}, {pipeline_mode = #tpu.pipeline_mode<synchronous>, transform_indices = @transform_1, window_bounds = array<i64: 32, 128>}, {pipeline_mode = #tpu.pipeline_mode<synchronous>, transform_indices = @transform_2, window_bounds = array<i64: 32, 128>}, {pipeline_mode = #tpu.pipeline_mode<synchronous>, transform_indices = @transform_3, window_bounds = array<i64: 1, 128>}, {pipeline_mode = #tpu.pipeline_mode<synchronous>, transform_indices = @transform_4, window_bounds = array<i64: 8, 32>}, {pipeline_mode = #tpu.pipeline_mode<synchronous>, transform_indices = @transform_5, window_bounds = array<i64: 8, 32>}, {pipeline_mode = #tpu.pipeline_mode<synchronous>, transform_indices = @transform_6, window_bounds = array<i64: 64, 128>}, {pipeline_mode = #tpu.pipeline_mode<synchronous>, transform_indices = @transform_7, window_bounds = array<i64: 8, 32>}, {pipeline_mode = #tpu.pipeline_mode<synchronous>, transform_indices = @transform_8, window_bounds = array<i64: 8, 32>}]} {
    %c0 = arith.constant 0 : index
    %c0_0 = arith.constant 0 : index
    %0 = vector.load %arg2[%c0, %c0_0] : memref<32x128xf32, #tpu.memory_space<vmem>>, vector<32x128xf32>
    %c0_1 = arith.constant 0 : index
    %c0_2 = arith.constant 0 : index
    %1 = vector.load %arg5[%c0_1, %c0_2] : memref<8x32xf32, #tpu.memory_space<vmem>>, vector<8x32xf32>
    %c0_3 = arith.constant 0 : index
    %c0_4 = arith.constant 0 : index
    %2 = vector.load %arg6[%c0_3, %c0_4] : memref<8x32xf32, #tpu.memory_space<vmem>>, vector<8x32xf32>
    %c0_i32 = arith.constant 0 : i32
    %3 = arith.index_cast %c0_i32 : i32 to index
    %c0_5 = arith.constant 0 : index
    %c0_6 = arith.constant 0 : index
    %4 = vector.load %arg1[%3, %c0_5, %c0_6] : memref<8x8x128xf32, #tpu.memory_space<vmem>>, vector<1x8x128xf32>
    %5 = vector.shape_cast %4 : vector<1x8x128xf32> to vector<8x128xf32>
    %cst = arith.constant dense<0.000000e+00> : vector<8x128xf32>
    %6 = tpu.matmul %1, %0, %cst {dimension_numbers = #tpu.dot_dimension_numbers<[1], [0], [0], [1], [0, 0, 1, 1], [], []>} : vector<8x32xf32>, vector<32x128xf32>, vector<8x128xf32> -> vector<8x128xf32>
    %7 = arith.addf %5, %6 : vector<8x128xf32>
    %8 = vector.extract_strided_slice %7 {offsets = [0, 0], sizes = [8, 32], strides = [1, 1]} : vector<8x128xf32> to vector<8x32xf32>
    %9 = arith.negf %8 : vector<8x32xf32>
    %10 = math.exp %9 : vector<8x32xf32>
    %cst_7 = arith.constant 1.000000e+00 : f32
    %11 = vector.broadcast %cst_7 : f32 to vector<8x32xf32>
    %12 = arith.addf %11, %10 : vector<8x32xf32>
    %13 = arith.divf %11, %12 : vector<8x32xf32>
    %14 = vector.extract_strided_slice %7 {offsets = [0, 32], sizes = [8, 32], strides = [1, 1]} : vector<8x128xf32> to vector<8x32xf32>
    %15 = arith.negf %14 : vector<8x32xf32>
    %16 = math.exp %15 : vector<8x32xf32>
    %cst_8 = arith.constant 1.000000e+00 : f32
    %17 = vector.broadcast %cst_8 : f32 to vector<8x32xf32>
    %18 = arith.addf %17, %16 : vector<8x32xf32>
    %19 = arith.divf %17, %18 : vector<8x32xf32>
    %20 = vector.extract_strided_slice %7 {offsets = [0, 64], sizes = [8, 32], strides = [1, 1]} : vector<8x128xf32> to vector<8x32xf32>
    %21 = math.tanh %20 : vector<8x32xf32>
    %22 = vector.extract_strided_slice %7 {offsets = [0, 96], sizes = [8, 32], strides = [1, 1]} : vector<8x128xf32> to vector<8x32xf32>
    %23 = arith.negf %22 : vector<8x32xf32>
    %24 = math.exp %23 : vector<8x32xf32>
    %cst_9 = arith.constant 1.000000e+00 : f32
    %25 = vector.broadcast %cst_9 : f32 to vector<8x32xf32>
    %26 = arith.addf %25, %24 : vector<8x32xf32>
    %27 = arith.divf %25, %26 : vector<8x32xf32>
    %28 = arith.mulf %19, %2 : vector<8x32xf32>
    %29 = arith.mulf %13, %21 : vector<8x32xf32>
    %30 = arith.addf %28, %29 : vector<8x32xf32>
    %31 = math.tanh %30 : vector<8x32xf32>
    %32 = arith.mulf %27, %31 : vector<8x32xf32>
    %c8_i32 = arith.constant 8 : i32
    %33 = arith.muli %c0_i32, %c8_i32 : i32
    %34 = arith.index_cast %33 : i32 to index
    %c0_10 = arith.constant 0 : index
    %35 = vector.load %arg10[%34, %c0_10] : memref<64x32xf32, #tpu.memory_space<vmem>>, vector<8x32xf32>
    tpu.vector_store %arg10[%34, %c0_10], %32 {strides = array<i32>} : memref<64x32xf32, #tpu.memory_space<vmem>>, vector<8x32xf32>,
    %c1_i32 = arith.constant 1 : i32
    %36 = arith.index_cast %c1_i32 : i32 to index
    %c0_11 = arith.constant 0 : index
    %c0_12 = arith.constant 0 : index
    %37 = vector.load %arg1[%36, %c0_11, %c0_12] : memref<8x8x128xf32, #tpu.memory_space<vmem>>, vector<1x8x128xf32>
    %38 = vector.shape_cast %37 : vector<1x8x128xf32> to vector<8x128xf32>
    %cst_13 = arith.constant dense<0.000000e+00> : vector<8x128xf32>
    %39 = tpu.matmul %32, %0, %cst_13 {dimension_numbers = #tpu.dot_dimension_numbers<[1], [0], [0], [1], [0, 0, 1, 1], [], []>} : vector<8x32xf32>, vector<32x128xf32>, vector<8x128xf32> -> vector<8x128xf32>
    %40 = arith.addf %38, %39 : vector<8x128xf32>
    %41 = vector.extract_strided_slice %40 {offsets = [0, 0], sizes = [8, 32], strides = [1, 1]} : vector<8x128xf32> to vector<8x32xf32>
    %42 = arith.negf %41 : vector<8x32xf32>
    %43 = math.exp %42 : vector<8x32xf32>
    %cst_14 = arith.constant 1.000000e+00 : f32
    %44 = vector.broadcast %cst_14 : f32 to vector<8x32xf32>
    %45 = arith.addf %44, %43 : vector<8x32xf32>
    %46 = arith.divf %44, %45 : vector<8x32xf32>
    %47 = vector.extract_strided_slice %40 {offsets = [0, 32], sizes = [8, 32], strides = [1, 1]} : vector<8x128xf32> to vector<8x32xf32>
    %48 = arith.negf %47 : vector<8x32xf32>
    %49 = math.exp %48 : vector<8x32xf32>
    %cst_15 = arith.constant 1.000000e+00 : f32
    %50 = vector.broadcast %cst_15 : f32 to vector<8x32xf32>
    %51 = arith.addf %50, %49 : vector<8x32xf32>
    %52 = arith.divf %50, %51 : vector<8x32xf32>
    %53 = vector.extract_strided_slice %40 {offsets = [0, 64], sizes = [8, 32], strides = [1, 1]} : vector<8x128xf32> to vector<8x32xf32>
    %54 = math.tanh %53 : vector<8x32xf32>
    %55 = vector.extract_strided_slice %40 {offsets = [0, 96], sizes = [8, 32], strides = [1, 1]} : vector<8x128xf32> to vector<8x32xf32>
    %56 = arith.negf %55 : vector<8x32xf32>
    %57 = math.exp %56 : vector<8x32xf32>
    %cst_16 = arith.constant 1.000000e+00 : f32
    %58 = vector.broadcast %cst_16 : f32 to vector<8x32xf32>
    %59 = arith.addf %58, %57 : vector<8x32xf32>
    %60 = arith.divf %58, %59 : vector<8x32xf32>
    %61 = arith.mulf %52, %30 : vector<8x32xf32>
    %62 = arith.mulf %46, %54 : vector<8x32xf32>
    %63 = arith.addf %61, %62 : vector<8x32xf32>
    %64 = math.tanh %63 : vector<8x32xf32>
    %65 = arith.mulf %60, %64 : vector<8x32xf32>
    %c8_i32_17 = arith.constant 8 : i32
    %66 = arith.muli %c1_i32, %c8_i32_17 : i32
    %67 = arith.index_cast %66 : i32 to index
    %c0_18 = arith.constant 0 : index
    %68 = vector.load %arg10[%67, %c0_18] : memref<64x32xf32, #tpu.memory_space<vmem>>, vector<8x32xf32>
    tpu.vector_store %arg10[%67, %c0_18], %65 {strides = array<i32>} : memref<64x32xf32, #tpu.memory_space<vmem>>, vector<8x32xf32>,
    %c2_i32 = arith.constant 2 : i32
    %69 = arith.index_cast %c2_i32 : i32 to index
    %c0_19 = arith.constant 0 : index
    %c0_20 = arith.constant 0 : index
    %70 = vector.load %arg1[%69, %c0_19, %c0_20] : memref<8x8x128xf32, #tpu.memory_space<vmem>>, vector<1x8x128xf32>
    %71 = vector.shape_cast %70 : vector<1x8x128xf32> to vector<8x128xf32>
    %cst_21 = arith.constant dense<0.000000e+00> : vector<8x128xf32>
    %72 = tpu.matmul %65, %0, %cst_21 {dimension_numbers = #tpu.dot_dimension_numbers<[1], [0], [0], [1], [0, 0, 1, 1], [], []>} : vector<8x32xf32>, vector<32x128xf32>, vector<8x128xf32> -> vector<8x128xf32>
    %73 = arith.addf %71, %72 : vector<8x128xf32>
    %74 = vector.extract_strided_slice %73 {offsets = [0, 0], sizes = [8, 32], strides = [1, 1]} : vector<8x128xf32> to vector<8x32xf32>
    %75 = arith.negf %74 : vector<8x32xf32>
    %76 = math.exp %75 : vector<8x32xf32>
    %cst_22 = arith.constant 1.000000e+00 : f32
    %77 = vector.broadcast %cst_22 : f32 to vector<8x32xf32>
    %78 = arith.addf %77, %76 : vector<8x32xf32>
    %79 = arith.divf %77, %78 : vector<8x32xf32>
    %80 = vector.extract_strided_slice %73 {offsets = [0, 32], sizes = [8, 32], strides = [1, 1]} : vector<8x128xf32> to vector<8x32xf32>
    %81 = arith.negf %80 : vector<8x32xf32>
    %82 = math.exp %81 : vector<8x32xf32>
    %cst_23 = arith.constant 1.000000e+00 : f32
    %83 = vector.broadcast %cst_23 : f32 to vector<8x32xf32>
    %84 = arith.addf %83, %82 : vector<8x32xf32>
    %85 = arith.divf %83, %84 : vector<8x32xf32>
    %86 = vector.extract_strided_slice %73 {offsets = [0, 64], sizes = [8, 32], strides = [1, 1]} : vector<8x128xf32> to vector<8x32xf32>
    %87 = math.tanh %86 : vector<8x32xf32>
    %88 = vector.extract_strided_slice %73 {offsets = [0, 96], sizes = [8, 32], strides = [1, 1]} : vector<8x128xf32> to vector<8x32xf32>
    %89 = arith.negf %88 : vector<8x32xf32>
    %90 = math.exp %89 : vector<8x32xf32>
    %cst_24 = arith.constant 1.000000e+00 : f32
    %91 = vector.broadcast %cst_24 : f32 to vector<8x32xf32>
    %92 = arith.addf %91, %90 : vector<8x32xf32>
    %93 = arith.divf %91, %92 : vector<8x32xf32>
    %94 = arith.mulf %85, %63 : vector<8x32xf32>
    %95 = arith.mulf %79, %87 : vector<8x32xf32>
    %96 = arith.addf %94, %95 : vector<8x32xf32>
    %97 = math.tanh %96 : vector<8x32xf32>
    %98 = arith.mulf %93, %97 : vector<8x32xf32>
    %c8_i32_25 = arith.constant 8 : i32
    %99 = arith.muli %c2_i32, %c8_i32_25 : i32
    %100 = arith.index_cast %99 : i32 to index
    %c0_26 = arith.constant 0 : index
    %101 = vector.load %arg10[%100, %c0_26] : memref<64x32xf32, #tpu.memory_space<vmem>>, vector<8x32xf32>
    tpu.vector_store %arg10[%100, %c0_26], %98 {strides = array<i32>} : memref<64x32xf32, #tpu.memory_space<vmem>>, vector<8x32xf32>,
    %c3_i32 = arith.constant 3 : i32
    %102 = arith.index_cast %c3_i32 : i32 to index
    %c0_27 = arith.constant 0 : index
    %c0_28 = arith.constant 0 : index
    %103 = vector.load %arg1[%102, %c0_27, %c0_28] : memref<8x8x128xf32, #tpu.memory_space<vmem>>, vector<1x8x128xf32>
    %104 = vector.shape_cast %103 : vector<1x8x128xf32> to vector<8x128xf32>
    %cst_29 = arith.constant dense<0.000000e+00> : vector<8x128xf32>
    %105 = tpu.matmul %98, %0, %cst_29 {dimension_numbers = #tpu.dot_dimension_numbers<[1], [0], [0], [1], [0, 0, 1, 1], [], []>} : vector<8x32xf32>, vector<32x128xf32>, vector<8x128xf32> -> vector<8x128xf32>
    %106 = arith.addf %104, %105 : vector<8x128xf32>
    %107 = vector.extract_strided_slice %106 {offsets = [0, 0], sizes = [8, 32], strides = [1, 1]} : vector<8x128xf32> to vector<8x32xf32>
    %108 = arith.negf %107 : vector<8x32xf32>
    %109 = math.exp %108 : vector<8x32xf32>
    %cst_30 = arith.constant 1.000000e+00 : f32
    %110 = vector.broadcast %cst_30 : f32 to vector<8x32xf32>
    %111 = arith.addf %110, %109 : vector<8x32xf32>
    %112 = arith.divf %110, %111 : vector<8x32xf32>
    %113 = vector.extract_strided_slice %106 {offsets = [0, 32], sizes = [8, 32], strides = [1, 1]} : vector<8x128xf32> to vector<8x32xf32>
    %114 = arith.negf %113 : vector<8x32xf32>
    %115 = math.exp %114 : vector<8x32xf32>
    %cst_31 = arith.constant 1.000000e+00 : f32
    %116 = vector.broadcast %cst_31 : f32 to vector<8x32xf32>
    %117 = arith.addf %116, %115 : vector<8x32xf32>
    %118 = arith.divf %116, %117 : vector<8x32xf32>
    %119 = vector.extract_strided_slice %106 {offsets = [0, 64], sizes = [8, 32], strides = [1, 1]} : vector<8x128xf32> to vector<8x32xf32>
    %120 = math.tanh %119 : vector<8x32xf32>
    %121 = vector.extract_strided_slice %106 {offsets = [0, 96], sizes = [8, 32], strides = [1, 1]} : vector<8x128xf32> to vector<8x32xf32>
    %122 = arith.negf %121 : vector<8x32xf32>
    %123 = math.exp %122 : vector<8x32xf32>
    %cst_32 = arith.constant 1.000000e+00 : f32
    %124 = vector.broadcast %cst_32 : f32 to vector<8x32xf32>
    %125 = arith.addf %124, %123 : vector<8x32xf32>
    %126 = arith.divf %124, %125 : vector<8x32xf32>
    %127 = arith.mulf %118, %96 : vector<8x32xf32>
    %128 = arith.mulf %112, %120 : vector<8x32xf32>
    %129 = arith.addf %127, %128 : vector<8x32xf32>
    %130 = math.tanh %129 : vector<8x32xf32>
    %131 = arith.mulf %126, %130 : vector<8x32xf32>
    %c8_i32_33 = arith.constant 8 : i32
    %132 = arith.muli %c3_i32, %c8_i32_33 : i32
    %133 = arith.index_cast %132 : i32 to index
    %c0_34 = arith.constant 0 : index
    %134 = vector.load %arg10[%133, %c0_34] : memref<64x32xf32, #tpu.memory_space<vmem>>, vector<8x32xf32>
    tpu.vector_store %arg10[%133, %c0_34], %131 {strides = array<i32>} : memref<64x32xf32, #tpu.memory_space<vmem>>, vector<8x32xf32>,
    %c4_i32 = arith.constant 4 : i32
    %135 = arith.index_cast %c4_i32 : i32 to index
    %c0_35 = arith.constant 0 : index
    %c0_36 = arith.constant 0 : index
    %136 = vector.load %arg1[%135, %c0_35, %c0_36] : memref<8x8x128xf32, #tpu.memory_space<vmem>>, vector<1x8x128xf32>
    %137 = vector.shape_cast %136 : vector<1x8x128xf32> to vector<8x128xf32>
    %cst_37 = arith.constant dense<0.000000e+00> : vector<8x128xf32>
    %138 = tpu.matmul %131, %0, %cst_37 {dimension_numbers = #tpu.dot_dimension_numbers<[1], [0], [0], [1], [0, 0, 1, 1], [], []>} : vector<8x32xf32>, vector<32x128xf32>, vector<8x128xf32> -> vector<8x128xf32>
    %139 = arith.addf %137, %138 : vector<8x128xf32>
    %140 = vector.extract_strided_slice %139 {offsets = [0, 0], sizes = [8, 32], strides = [1, 1]} : vector<8x128xf32> to vector<8x32xf32>
    %141 = arith.negf %140 : vector<8x32xf32>
    %142 = math.exp %141 : vector<8x32xf32>
    %cst_38 = arith.constant 1.000000e+00 : f32
    %143 = vector.broadcast %cst_38 : f32 to vector<8x32xf32>
    %144 = arith.addf %143, %142 : vector<8x32xf32>
    %145 = arith.divf %143, %144 : vector<8x32xf32>
    %146 = vector.extract_strided_slice %139 {offsets = [0, 32], sizes = [8, 32], strides = [1, 1]} : vector<8x128xf32> to vector<8x32xf32>
    %147 = arith.negf %146 : vector<8x32xf32>
    %148 = math.exp %147 : vector<8x32xf32>
    %cst_39 = arith.constant 1.000000e+00 : f32
    %149 = vector.broadcast %cst_39 : f32 to vector<8x32xf32>
    %150 = arith.addf %149, %148 : vector<8x32xf32>
    %151 = arith.divf %149, %150 : vector<8x32xf32>
    %152 = vector.extract_strided_slice %139 {offsets = [0, 64], sizes = [8, 32], strides = [1, 1]} : vector<8x128xf32> to vector<8x32xf32>
    %153 = math.tanh %152 : vector<8x32xf32>
    %154 = vector.extract_strided_slice %139 {offsets = [0, 96], sizes = [8, 32], strides = [1, 1]} : vector<8x128xf32> to vector<8x32xf32>
    %155 = arith.negf %154 : vector<8x32xf32>
    %156 = math.exp %155 : vector<8x32xf32>
    %cst_40 = arith.constant 1.000000e+00 : f32
    %157 = vector.broadcast %cst_40 : f32 to vector<8x32xf32>
    %158 = arith.addf %157, %156 : vector<8x32xf32>
    %159 = arith.divf %157, %158 : vector<8x32xf32>
    %160 = arith.mulf %151, %129 : vector<8x32xf32>
    %161 = arith.mulf %145, %153 : vector<8x32xf32>
    %162 = arith.addf %160, %161 : vector<8x32xf32>
    %163 = math.tanh %162 : vector<8x32xf32>
    %164 = arith.mulf %159, %163 : vector<8x32xf32>
    %c8_i32_41 = arith.constant 8 : i32
    %165 = arith.muli %c4_i32, %c8_i32_41 : i32
    %166 = arith.index_cast %165 : i32 to index
    %c0_42 = arith.constant 0 : index
    %167 = vector.load %arg10[%166, %c0_42] : memref<64x32xf32, #tpu.memory_space<vmem>>, vector<8x32xf32>
    tpu.vector_store %arg10[%166, %c0_42], %164 {strides = array<i32>} : memref<64x32xf32, #tpu.memory_space<vmem>>, vector<8x32xf32>,
    %c5_i32 = arith.constant 5 : i32
    %168 = arith.index_cast %c5_i32 : i32 to index
    %c0_43 = arith.constant 0 : index
    %c0_44 = arith.constant 0 : index
    %169 = vector.load %arg1[%168, %c0_43, %c0_44] : memref<8x8x128xf32, #tpu.memory_space<vmem>>, vector<1x8x128xf32>
    %170 = vector.shape_cast %169 : vector<1x8x128xf32> to vector<8x128xf32>
    %cst_45 = arith.constant dense<0.000000e+00> : vector<8x128xf32>
    %171 = tpu.matmul %164, %0, %cst_45 {dimension_numbers = #tpu.dot_dimension_numbers<[1], [0], [0], [1], [0, 0, 1, 1], [], []>} : vector<8x32xf32>, vector<32x128xf32>, vector<8x128xf32> -> vector<8x128xf32>
    %172 = arith.addf %170, %171 : vector<8x128xf32>
    %173 = vector.extract_strided_slice %172 {offsets = [0, 0], sizes = [8, 32], strides = [1, 1]} : vector<8x128xf32> to vector<8x32xf32>
    %174 = arith.negf %173 : vector<8x32xf32>
    %175 = math.exp %174 : vector<8x32xf32>
    %cst_46 = arith.constant 1.000000e+00 : f32
    %176 = vector.broadcast %cst_46 : f32 to vector<8x32xf32>
    %177 = arith.addf %176, %175 : vector<8x32xf32>
    %178 = arith.divf %176, %177 : vector<8x32xf32>
    %179 = vector.extract_strided_slice %172 {offsets = [0, 32], sizes = [8, 32], strides = [1, 1]} : vector<8x128xf32> to vector<8x32xf32>
    %180 = arith.negf %179 : vector<8x32xf32>
    %181 = math.exp %180 : vector<8x32xf32>
    %cst_47 = arith.constant 1.000000e+00 : f32
    %182 = vector.broadcast %cst_47 : f32 to vector<8x32xf32>
    %183 = arith.addf %182, %181 : vector<8x32xf32>
    %184 = arith.divf %182, %183 : vector<8x32xf32>
    %185 = vector.extract_strided_slice %172 {offsets = [0, 64], sizes = [8, 32], strides = [1, 1]} : vector<8x128xf32> to vector<8x32xf32>
    %186 = math.tanh %185 : vector<8x32xf32>
    %187 = vector.extract_strided_slice %172 {offsets = [0, 96], sizes = [8, 32], strides = [1, 1]} : vector<8x128xf32> to vector<8x32xf32>
    %188 = arith.negf %187 : vector<8x32xf32>
    %189 = math.exp %188 : vector<8x32xf32>
    %cst_48 = arith.constant 1.000000e+00 : f32
    %190 = vector.broadcast %cst_48 : f32 to vector<8x32xf32>
    %191 = arith.addf %190, %189 : vector<8x32xf32>
    %192 = arith.divf %190, %191 : vector<8x32xf32>
    %193 = arith.mulf %184, %162 : vector<8x32xf32>
    %194 = arith.mulf %178, %186 : vector<8x32xf32>
    %195 = arith.addf %193, %194 : vector<8x32xf32>
    %196 = math.tanh %195 : vector<8x32xf32>
    %197 = arith.mulf %192, %196 : vector<8x32xf32>
    %c8_i32_49 = arith.constant 8 : i32
    %198 = arith.muli %c5_i32, %c8_i32_49 : i32
    %199 = arith.index_cast %198 : i32 to index
    %c0_50 = arith.constant 0 : index
    %200 = vector.load %arg10[%199, %c0_50] : memref<64x32xf32, #tpu.memory_space<vmem>>, vector<8x32xf32>
    tpu.vector_store %arg10[%199, %c0_50], %197 {strides = array<i32>} : memref<64x32xf32, #tpu.memory_space<vmem>>, vector<8x32xf32>,
    %c6_i32 = arith.constant 6 : i32
    %201 = arith.index_cast %c6_i32 : i32 to index
    %c0_51 = arith.constant 0 : index
    %c0_52 = arith.constant 0 : index
    %202 = vector.load %arg1[%201, %c0_51, %c0_52] : memref<8x8x128xf32, #tpu.memory_space<vmem>>, vector<1x8x128xf32>
    %203 = vector.shape_cast %202 : vector<1x8x128xf32> to vector<8x128xf32>
    %cst_53 = arith.constant dense<0.000000e+00> : vector<8x128xf32>
    %204 = tpu.matmul %197, %0, %cst_53 {dimension_numbers = #tpu.dot_dimension_numbers<[1], [0], [0], [1], [0, 0, 1, 1], [], []>} : vector<8x32xf32>, vector<32x128xf32>, vector<8x128xf32> -> vector<8x128xf32>
    %205 = arith.addf %203, %204 : vector<8x128xf32>
    %206 = vector.extract_strided_slice %205 {offsets = [0, 0], sizes = [8, 32], strides = [1, 1]} : vector<8x128xf32> to vector<8x32xf32>
    %207 = arith.negf %206 : vector<8x32xf32>
    %208 = math.exp %207 : vector<8x32xf32>
    %cst_54 = arith.constant 1.000000e+00 : f32
    %209 = vector.broadcast %cst_54 : f32 to vector<8x32xf32>
    %210 = arith.addf %209, %208 : vector<8x32xf32>
    %211 = arith.divf %209, %210 : vector<8x32xf32>
    %212 = vector.extract_strided_slice %205 {offsets = [0, 32], sizes = [8, 32], strides = [1, 1]} : vector<8x128xf32> to vector<8x32xf32>
    %213 = arith.negf %212 : vector<8x32xf32>
    %214 = math.exp %213 : vector<8x32xf32>
    %cst_55 = arith.constant 1.000000e+00 : f32
    %215 = vector.broadcast %cst_55 : f32 to vector<8x32xf32>
    %216 = arith.addf %215, %214 : vector<8x32xf32>
    %217 = arith.divf %215, %216 : vector<8x32xf32>
    %218 = vector.extract_strided_slice %205 {offsets = [0, 64], sizes = [8, 32], strides = [1, 1]} : vector<8x128xf32> to vector<8x32xf32>
    %219 = math.tanh %218 : vector<8x32xf32>
    %220 = vector.extract_strided_slice %205 {offsets = [0, 96], sizes = [8, 32], strides = [1, 1]} : vector<8x128xf32> to vector<8x32xf32>
    %221 = arith.negf %220 : vector<8x32xf32>
    %222 = math.exp %221 : vector<8x32xf32>
    %cst_56 = arith.constant 1.000000e+00 : f32
    %223 = vector.broadcast %cst_56 : f32 to vector<8x32xf32>
    %224 = arith.addf %223, %222 : vector<8x32xf32>
    %225 = arith.divf %223, %224 : vector<8x32xf32>
    %226 = arith.mulf %217, %195 : vector<8x32xf32>
    %227 = arith.mulf %211, %219 : vector<8x32xf32>
    %228 = arith.addf %226, %227 : vector<8x32xf32>
    %229 = math.tanh %228 : vector<8x32xf32>
    %230 = arith.mulf %225, %229 : vector<8x32xf32>
    %c8_i32_57 = arith.constant 8 : i32
    %231 = arith.muli %c6_i32, %c8_i32_57 : i32
    %232 = arith.index_cast %231 : i32 to index
    %c0_58 = arith.constant 0 : index
    %233 = vector.load %arg10[%232, %c0_58] : memref<64x32xf32, #tpu.memory_space<vmem>>, vector<8x32xf32>
    tpu.vector_store %arg10[%232, %c0_58], %230 {strides = array<i32>} : memref<64x32xf32, #tpu.memory_space<vmem>>, vector<8x32xf32>,
    %c7_i32 = arith.constant 7 : i32
    %234 = arith.index_cast %c7_i32 : i32 to index
    %c0_59 = arith.constant 0 : index
    %c0_60 = arith.constant 0 : index
    %235 = vector.load %arg1[%234, %c0_59, %c0_60] : memref<8x8x128xf32, #tpu.memory_space<vmem>>, vector<1x8x128xf32>
    %236 = vector.shape_cast %235 : vector<1x8x128xf32> to vector<8x128xf32>
    %cst_61 = arith.constant dense<0.000000e+00> : vector<8x128xf32>
    %237 = tpu.matmul %230, %0, %cst_61 {dimension_numbers = #tpu.dot_dimension_numbers<[1], [0], [0], [1], [0, 0, 1, 1], [], []>} : vector<8x32xf32>, vector<32x128xf32>, vector<8x128xf32> -> vector<8x128xf32>
    %238 = arith.addf %236, %237 : vector<8x128xf32>
    %239 = vector.extract_strided_slice %238 {offsets = [0, 0], sizes = [8, 32], strides = [1, 1]} : vector<8x128xf32> to vector<8x32xf32>
    %240 = arith.negf %239 : vector<8x32xf32>
    %241 = math.exp %240 : vector<8x32xf32>
    %cst_62 = arith.constant 1.000000e+00 : f32
    %242 = vector.broadcast %cst_62 : f32 to vector<8x32xf32>
    %243 = arith.addf %242, %241 : vector<8x32xf32>
    %244 = arith.divf %242, %243 : vector<8x32xf32>
    %245 = vector.extract_strided_slice %238 {offsets = [0, 32], sizes = [8, 32], strides = [1, 1]} : vector<8x128xf32> to vector<8x32xf32>
    %246 = arith.negf %245 : vector<8x32xf32>
    %247 = math.exp %246 : vector<8x32xf32>
    %cst_63 = arith.constant 1.000000e+00 : f32
    %248 = vector.broadcast %cst_63 : f32 to vector<8x32xf32>
    %249 = arith.addf %248, %247 : vector<8x32xf32>
    %250 = arith.divf %248, %249 : vector<8x32xf32>
    %251 = vector.extract_strided_slice %238 {offsets = [0, 64], sizes = [8, 32], strides = [1, 1]} : vector<8x128xf32> to vector<8x32xf32>
    %252 = math.tanh %251 : vector<8x32xf32>
    %253 = vector.extract_strided_slice %238 {offsets = [0, 96], sizes = [8, 32], strides = [1, 1]} : vector<8x128xf32> to vector<8x32xf32>
    %254 = arith.negf %253 : vector<8x32xf32>
    %255 = math.exp %254 : vector<8x32xf32>
    %cst_64 = arith.constant 1.000000e+00 : f32
    %256 = vector.broadcast %cst_64 : f32 to vector<8x32xf32>
    %257 = arith.addf %256, %255 : vector<8x32xf32>
    %258 = arith.divf %256, %257 : vector<8x32xf32>
    %259 = arith.mulf %250, %228 : vector<8x32xf32>
    %260 = arith.mulf %244, %252 : vector<8x32xf32>
    %261 = arith.addf %259, %260 : vector<8x32xf32>
    %262 = math.tanh %261 : vector<8x32xf32>
    %263 = arith.mulf %258, %262 : vector<8x32xf32>
    %c8_i32_65 = arith.constant 8 : i32
    %264 = arith.muli %c7_i32, %c8_i32_65 : i32
    %265 = arith.index_cast %264 : i32 to index
    %c0_66 = arith.constant 0 : index
    %266 = vector.load %arg10[%265, %c0_66] : memref<64x32xf32, #tpu.memory_space<vmem>>, vector<8x32xf32>
    tpu.vector_store %arg10[%265, %c0_66], %263 {strides = array<i32>} : memref<64x32xf32, #tpu.memory_space<vmem>>, vector<8x32xf32>,
    %c8_i32_67 = arith.constant 8 : i32
    %c0_68 = arith.constant 0 : index
    %c0_69 = arith.constant 0 : index
    %267 = vector.load %arg8[%c0_68, %c0_69] : memref<8x32xf32, #tpu.memory_space<vmem>>, vector<8x32xf32>
    tpu.vector_store %arg8[%c0_68, %c0_69], %263 {strides = array<i32>} : memref<8x32xf32, #tpu.memory_space<vmem>>, vector<8x32xf32>,
    %c0_70 = arith.constant 0 : index
    %c0_71 = arith.constant 0 : index
    %268 = vector.load %arg9[%c0_70, %c0_71] : memref<8x32xf32, #tpu.memory_space<vmem>>, vector<8x32xf32>
    tpu.vector_store %arg9[%c0_70, %c0_71], %261 {strides = array<i32>} : memref<8x32xf32, #tpu.memory_space<vmem>>, vector<8x32xf32>,
    %c0_72 = arith.constant 0 : index
    %c0_73 = arith.constant 0 : index
    %269 = vector.load %arg10[%c0_72, %c0_73] : memref<64x32xf32, #tpu.memory_space<vmem>>, vector<64x32xf32>
    %c0_74 = arith.constant 0 : index
    %c0_75 = arith.constant 0 : index
    %270 = vector.load %arg3[%c0_74, %c0_75] : memref<32x128xf32, #tpu.memory_space<vmem>>, vector<32x128xf32>
    %cst_76 = arith.constant dense<0.000000e+00> : vector<64x128xf32>
    %271 = tpu.matmul %269, %270, %cst_76 {dimension_numbers = #tpu.dot_dimension_numbers<[1], [0], [0], [1], [0, 0, 1, 1], [], []>} : vector<64x32xf32>, vector<32x128xf32>, vector<64x128xf32> -> vector<64x128xf32>
    %c0_77 = arith.constant 0 : index
    %c0_78 = arith.constant 0 : index
    %272 = vector.load %arg4[%c0_77, %c0_78] : memref<1x128xf32, #tpu.memory_space<vmem>>, vector<1x128xf32>
    %273 = vector.broadcast %272 : vector<1x128xf32> to vector<64x128xf32>
    %274 = arith.addf %271, %273 : vector<64x128xf32>
    %c0_79 = arith.constant 0 : index
    %c0_80 = arith.constant 0 : index
    %275 = vector.load %arg7[%c0_79, %c0_80] : memref<64x128xf32, #tpu.memory_space<vmem>>, vector<64x128xf32>
    tpu.vector_store %arg7[%c0_79, %c0_80], %274 {strides = array<i32>} : memref<64x128xf32, #tpu.memory_space<vmem>>, vector<64x128xf32>,
    return
  }
  func.func @transform_0(%arg0: i32) -> (i32, i32, i32) {
    %c0_i32 = arith.constant 0 : i32
    %c0_i32_0 = arith.constant 0 : i32
    %c0_i32_1 = arith.constant 0 : i32
    %c0_i32_2 = arith.constant 0 : i32
    return %c0_i32, %c0_i32_0, %c0_i32_1 : i32, i32, i32
  }
  func.func @transform_1(%arg0: i32) -> (i32, i32) {
    %c0_i32 = arith.constant 0 : i32
    %c0_i32_0 = arith.constant 0 : i32
    %c0_i32_1 = arith.constant 0 : i32
    return %c0_i32, %c0_i32_0 : i32, i32
  }
  func.func @transform_2(%arg0: i32) -> (i32, i32) {
    %c0_i32 = arith.constant 0 : i32
    %c0_i32_0 = arith.constant 0 : i32
    %c0_i32_1 = arith.constant 0 : i32
    return %c0_i32, %c0_i32_0 : i32, i32
  }
  func.func @transform_3(%arg0: i32) -> (i32, i32) {
    %c0_i32 = arith.constant 0 : i32
    %c0_i32_0 = arith.constant 0 : i32
    %c0_i32_1 = arith.constant 0 : i32
    return %c0_i32, %c0_i32_0 : i32, i32
  }
  func.func @transform_4(%arg0: i32) -> (i32, i32) {
    %c0_i32 = arith.constant 0 : i32
    %c0_i32_0 = arith.constant 0 : i32
    %c0_i32_1 = arith.constant 0 : i32
    return %c0_i32, %c0_i32_0 : i32, i32
  }
  func.func @transform_5(%arg0: i32) -> (i32, i32) {
    %c0_i32 = arith.constant 0 : i32
    %c0_i32_0 = arith.constant 0 : i32
    %c0_i32_1 = arith.constant 0 : i32
    return %c0_i32, %c0_i32_0 : i32, i32
  }
  func.func @transform_6(%arg0: i32) -> (i32, i32) {
    %c0_i32 = arith.constant 0 : i32
    %c0_i32_0 = arith.constant 0 : i32
    %c0_i32_1 = arith.constant 0 : i32
    return %c0_i32, %c0_i32_0 : i32, i32
  }
  func.func @transform_7(%arg0: i32) -> (i32, i32) {
    %c0_i32 = arith.constant 0 : i32
    %c0_i32_0 = arith.constant 0 : i32
    %c0_i32_1 = arith.constant 0 : i32
    return %c0_i32, %c0_i32_0 : i32, i32
  }
  func.func @transform_8(%arg0: i32) -> (i32, i32) {
    %c0_i32 = arith.constant 0 : i32
    %c0_i32_0 = arith.constant 0 : i32
    %c0_i32_1 = arith.constant 0 : i32
    return %c0_i32, %c0_i32_0 : i32, i32
  }
}

</mosaic_0001>

<bundles_post_ra>
// kernel: tpu_custom_call.1
= control target key start
LH: loop header
LB: loop body
LE: loop exit
PB: predicated region body
PF: predicated region fallthrough
CT: control target
= control target key end

     0   :  { %14 = vsyncpa [#allocation4], 0  ;;  %s1862_s0 = inlined_call_operand.hbm [shape: f32[8,8,128], index: 0, kind: input, shape index: {}]   ;;  %s1863_s1 = inlined_call_operand.hbm [shape: f32[32,128], index: 1, kind: input, shape index: {}]   ;;  %s1864_s2 = inlined_call_operand.hbm [shape: f32[32,128], index: 2, kind: input, shape index: {}]   ;;  %s1865_s3 = inlined_call_operand.vmem [shape: f32[1,128], index: 3, kind: input, shape index: {}]   ;;  %s1866_s4 = inlined_call_operand.vmem [shape: f32[8,32], index: 4, kind: input, shape index: {}]   ;;  %s1867_s5 = inlined_call_operand.vmem [shape: f32[8,32], index: 5, kind: input, shape index: {}]   ;;  %s1868_s6 = inlined_call_operand.hbm [shape: f32[64,128], index: 6, kind: output, shape index: {0}]   ;;  %s1869_s7 = inlined_call_operand.hbm [shape: f32[8,32], index: 7, kind: output, shape index: {1}]   ;;  %s1870_s8 = inlined_call_operand.hbm [shape: f32[8,32], index: 8, kind: output, shape index: {2}]  }
   0x1   :  { %15 = vsyncpa [#allocation7], 0 }
   0x2   :  { %16 = vsyncpa [#allocation5], 0 }
   0x3   :  { %17 = vsyncpa [#allocation11], 0  ;;  %s1578_s27 = smov [#allocation6]   ;;  %s1579_s29 = smov [#allocation3]  }
   0x4   :  { %s35_s28 = sshll.u32 %s1578_s27, 4  ;;  %s23_s30 = sshll.u32 %s1579_s29, 4  ;;  %s36_s28 = int_to_ptr.vmem [resolvable:$true] %s35_s28  ;;  %s1637_s30 = int_to_ptr.vmem [resolvable:$true] %s23_s30 }
   0x5   :  { %s1438_s11 = scalar_lea.hbm %s1863_s1, 512 }
   0x6   :  { %p1439_p0 = scmp.ne.s32.totalorder %s1863_s1, %s1438_s11  ;;  %p1442_p1 = scmp.lt.u32.totalorder %s1438_s11, %s1863_s1 }
   0x8   :  { %p1444_p2 = pnand %p1442_p1, %p1439_p0 }
   0xa   :  { %1447 = shalt.err (!%p1444_p2)
}
   0xb   :  { %s1448_s16 = scalar_lea.vmem %s36_s28, 512  ;;  %p1453_p4 = scmp.lt.s32.totalorder %s36_s28, %s36_s28 }
   0xc   :  { %p1449_p3 = scmp.ne.s32.totalorder %s36_s28, %s1448_s16  ;;  %p1454_p5 = scmp.lt.s32.totalorder %s1448_s16, %s1448_s16 }
   0xe   :  { %p1455_p6 = por %p1454_p5, %p1453_p4 }
  0x10   :  { %p1456_p7 = pnand %p1455_p6, %p1449_p3 }
  0x12   :  { %1459 = shalt.err (!%p1456_p7)
}
  0x13   :  { %s1580_s17 = smov 128   ;;  %s1581_s18 = smov 8  }
  0x14   :  { %41 = dma.hbm_to_vmem [thread:$0]  %s1863_s1, 512, %s36_s28, [#allocation7], %s1580_s17, %s1580_s17, %s1581_s18  }
  0x15   :  { %s1460_s23 = scalar_lea.hbm %s1862_s0, 1024 }
  0x16   :  { %p1461_p8 = scmp.ne.s32.totalorder %s1862_s0, %s1460_s23  ;;  %p1464_p9 = scmp.lt.u32.totalorder %s1460_s23, %s1862_s0 }
  0x18   :  { %p1466_p10 = pnand %p1464_p9, %p1461_p8 }
  0x1a   :  { %1469 = shalt.err (!%p1466_p10)
}
  0x1b   :  { %s1470_s29 = scalar_lea.vmem %s1637_s30, 1024  ;;  %p1475_p12 = scmp.lt.s32.totalorder %s1637_s30, %s1637_s30 }
  0x1c   :  { %p1471_p11 = scmp.ne.s32.totalorder %s1637_s30, %s1470_s29  ;;  %p1476_p13 = scmp.lt.s32.totalorder %s1470_s29, %s1470_s29 }
  0x1e   :  { %p1477_p0 = por %p1476_p13, %p1475_p12 }
  0x20   :  { %p1478_p1 = pnand %p1477_p0, %p1471_p11 }
  0x22   :  { %1481 = shalt.err (!%p1478_p1)
}
  0x23   :  { %29 = dma.hbm_to_vmem [thread:$0]  %s1862_s0, 1024, %s1637_s30, [#allocation4], %s1580_s17, %s1580_s17, %s1581_s18  }
  0x24   :  { %s1582_s9 = smov [#allocation8]   ;;  %s1482_s13 = scalar_lea.hbm %s1864_s2, 512 }
  0x25   :  { %s47_s10 = sshll.u32 %s1582_s9, 4  ;;  %p1483_p2 = scmp.ne.s32.totalorder %s1864_s2, %s1482_s13  ;;  %s48_s10 = int_to_ptr.vmem [resolvable:$true] %s47_s10 }
  0x26   :  { %p1486_p3 = scmp.lt.u32.totalorder %s1482_s13, %s1864_s2 }
  0x28   :  { %p1488_p4 = pnand %p1486_p3, %p1483_p2 }
  0x2a   :  { %1491 = shalt.err (!%p1488_p4)
}
  0x2b   :  { %s1492_s20 = scalar_lea.vmem %s48_s10, 512  ;;  %p1497_p6 = scmp.lt.s32.totalorder %s48_s10, %s48_s10 }
  0x2c   :  { %p1493_p5 = scmp.ne.s32.totalorder %s48_s10, %s1492_s20  ;;  %p1498_p7 = scmp.lt.s32.totalorder %s1492_s20, %s1492_s20 }
  0x2e   :  { %p1499_p8 = por %p1498_p7, %p1497_p6 }
  0x30   :  { %p1500_p9 = pnand %p1499_p8, %p1493_p5 }
  0x32   :  { %1503 = shalt.err (!%p1500_p9)
}
  0x33   :  { %53 = dma.hbm_to_vmem [thread:$0]  %s1864_s2, 512, %s48_s10, [#allocation7], %s1580_s17, %s1580_s17, %s1581_s18  }
  0x34   :  { %1570 = dma.done.wait [#allocation4], 1024  }
  0x35   :  { %1571 = vsyncadd [#allocation4], 4294966272 }
  0x36   :  { %1572 = dma.done.wait [#allocation7], 1024  }
  0x37   :  { %1573 = vsyncadd [#allocation7], 4294966272  ;;  %v1583_v0 = vmov 0.0|0.0   ;;  %vm1584_vm0 = vmmov 0   ;;  %v1585_v1 = vmov 0.0   ;;  %v69_v2 = vld [vmem:[#allocation6] sm:$0xff] }
  0x38   :  { %1304 = vmatprep.subr.bf16.mxu1 %v1583_v0  ;;  %1204 = vmatprep.mubr.msk.f32.mxu1 %vm1584_vm0, %v1585_v1  ;;  %v70_v3 = vld [vmem:[#allocation6 + $0x8] sm:$0xff]  ;;  %v71_v4 = vld [vmem:[#allocation6 + $0x10] sm:$0xff]  ;;  %v72_v6 = vld [vmem:[#allocation6 + $0x18] sm:$0xff]  ;;  %vm76_vm1 = vcmask 261120   ;;  %s1587_s24 = smov 32   ;;  %s1589_s26 = smov [#allocation10]  }
  0x39   :  { %1316 = vmatprep.subr.bf16.mxu0 %v1583_v0  ;;  %1226 = vmatprep.mubr.msk.f32.mxu0 %vm1584_vm0, %v1585_v1  ;;  %v1695_v5 = vpack.c.bf16 %v70_v3, %v69_v2  ;;  %v1698_v7 = vpack.c.bf16 %v72_v6, %v71_v4  ;;  %v73_v8 = vld [vmem:[%s1866_s4] sm:$0xff]  ;;  %s1586_s4 = smov 64   ;;  %v185_v29 = vld [vmem:[#allocation3 + $0x8] sm:$0xff]  ;;  %v289_v47 = vld [vmem:[#allocation3 + $0x10] sm:$0xff]  ;;  %s1092_s27 = sshll.u32 %s1589_s26, 4  ;;  %s1093_s27 = int_to_ptr.vmem [resolvable:$true] %s1092_s27 }
  0x3a   :  { %v75_v9 = vld [vmem:[#allocation3] sm:$0xff]  ;;  %v393_v3 = vld [vmem:[#allocation3 + $0x18] sm:$0xff]  ;;  %s1504_s29 = scalar_lea.vmem %s1093_s27, 128  ;;  %p1509_p11 = scmp.lt.s32.totalorder %s1093_s27, %s1093_s27 }
  0x3b   :  { %1306 = vmatpush3.bf16.msra.mxu1 %v1695_v5  ;;  %1318 = vmatpush3.bf16.msra.mxu0 %v1695_v5  ;;  %v74_v14 = vld [vmem:[%s1867_s5] sm:$0xff]  ;;  %p1505_p10 = scmp.ne.s32.totalorder %s1093_s27, %s1504_s29  ;;  %p1510_p12 = scmp.lt.s32.totalorder %s1504_s29, %s1504_s29 }
  0x3c   :  { %1307 = vmatprep.subr.bf16.mxu1 %v1583_v0  ;;  %1319 = vmatprep.subr.bf16.mxu0 %v1583_v0 }
  0x3d   :  { %p1511_p13 = por %p1510_p12, %p1509_p11 }
  0x3f   :  { %1309 = vmatpush3.bf16.msra.mxu1 %v1698_v7  ;;  %1321 = vmatpush3.bf16.msra.mxu0 %v1698_v7  ;;  %p1512_p0 = pnand %p1511_p13, %p1505_p10 }
  0x40   :  { %1310 = vmatprep.subr.bf16.mxu1 %v1583_v0  ;;  %1328 = vmatprep.subr.bf16.mxu0 %v1583_v0 }
  0x42   :  { %1205 = vmatmul.mubr.msk.f32.vlgmr.msra.gmra.mrb[0].mxu1 %vm76_vm1, %v73_v8 }
  0x43   :  { %1312 = vmatpush3.bf16.msra.mxu1 %v1695_v5  ;;  %1215 = vmatprep.mubr.msk.f32.mxu1 %vm1584_vm0, %v1585_v1 }
  0x44   :  { %1313 = vmatprep.subr.bf16.mxu1 %v1583_v0 }
  0x47   :  { %1315 = vmatpush3.bf16.msra.mxu1 %v1698_v7 }
  0x48   :  { %1322 = vmatprep.subr.bf16.mxu1 %v1583_v0 }
 0x115   :  { %v146_v10 = vpop.f32.mrb[0].mxu1 }
 0x116   :  { %v150_v11 = vadd.f32 %v146_v10, %v75_v9  ;;  %v1206_v12 = vpop.f32.mrb[1].mxu1 }
 0x118   :  { %1374 = vtanh.f32 %v150_v11  ;;  %v1120_v15 = vmul.f32 -1.442695, %v150_v11 }
 0x11a   :  { %1376 = vpow2.f32 %v1120_v15 }
 0x122   :  { %v1375_v13 = vpop.eup %1374 }
 0x123   :  { %164 = vrot.lane.b32.xlu0 %v1375_v13, %s1586_s4 }
 0x124   :  { %v1377_v16 = vpop.eup %1376 }
 0x125   :  { %v154_v17 = vadd.f32 1.0, %v1377_v16 }
 0x127   :  { %159 = vrot.lane.b32.xlu0 %v74_v14, %s1587_s24  ;;  %1378 = vrcp.f32 %v154_v17 }
 0x131   :  { %v1379_v18 = vpop.eup %1378 }
 0x195   :  { %v165_v19 = vpop.permute.xlu0 %164 }
 0x196   :  { %v167_v20 = vmul.f32 %v1379_v18, %v165_v19 }
 0x198   :  { %169 = vrot.lane.b32.xlu1 %v167_v20, %s1587_s24 }
 0x199   :  { %v160_v21 = vpop.permute.xlu0 %159 }
 0x19a   :  { %v162_v22 = vmul.f32 %v1379_v18, %v160_v21 }
 0x20a   :  { %v170_v23 = vpop.permute.xlu1 %169 }
 0x20b   :  { %v172_v24 = vadd.f32 %v170_v23, %v162_v22  ;;  %v497_v23 = vld [vmem:[#allocation3 + $0x20] sm:$0xff] }
 0x20d   :  { %1380 = vtanh.f32 %v172_v24 }
 0x217   :  { %v1381_v25 = vpop.eup %1380 }
 0x218   :  { %175 = vrot.lane.b32.xlu1 %v1381_v25, %s1586_s4 }
 0x28a   :  { %v176_v26 = vpop.permute.xlu1 %175 }
 0x28b   :  { %v178_v27 = vmul.f32 %v1379_v18, %v176_v26 }
 0x28d   :  { %180 = vrot.lane.b32.xlu0 %v178_v27, %s1587_s24 }
 0x2ff   :  { %v181_v28 = vpop.permute.xlu0 %180 }
 0x300   :  { %183 = vst.msk [vmem:[#allocation2] sm:$0xff] %vm76_vm1, %v181_v28  ;;  %1216 = vmatmul.mubr.msk.f32.vlgmr.msra.gmra.mrb[2].mxu1 %vm76_vm1, %v181_v28 }
 0x301   :  { %1324 = vmatpush3.bf16.msra.mxu1 %v1695_v5  ;;  %1237 = vmatprep.mubr.msk.f32.mxu1 %vm1584_vm0, %v1585_v1 }
 0x302   :  { %1325 = vmatprep.subr.bf16.mxu1 %v1583_v0 }
 0x305   :  { %1327 = vmatpush3.bf16.msra.mxu1 %v1698_v7 }
 0x306   :  { %1334 = vmatprep.subr.bf16.mxu1 %v1583_v0 }
 0x3d3   :  { %v254_v30 = vpop.f32.mrb[2].mxu1 }
 0x3d4   :  { %v258_v31 = vadd.f32 %v254_v30, %v185_v29  ;;  %v1217_v32 = vpop.f32.mrb[3].mxu1 }
 0x3d6   :  { %1382 = vtanh.f32 %v258_v31  ;;  %v1122_v34 = vmul.f32 -1.442695, %v258_v31 }
 0x3d8   :  { %1384 = vpow2.f32 %v1122_v34 }
 0x3e0   :  { %v1383_v33 = vpop.eup %1382 }
 0x3e1   :  { %268 = vrot.lane.b32.xlu1 %v1383_v33, %s1586_s4 }
 0x3e2   :  { %v1385_v35 = vpop.eup %1384 }
 0x3e3   :  { %v262_v36 = vadd.f32 1.0, %v1385_v35 }
 0x3e5   :  { %1386 = vrcp.f32 %v262_v36 }
 0x3ef   :  { %v1387_v37 = vpop.eup %1386 }
 0x3f0   :  { %v266_v40 = vmul.f32 %v1387_v37, %v172_v24 }
 0x453   :  { %v269_v38 = vpop.permute.xlu1 %268 }
 0x454   :  { %v271_v39 = vmul.f32 %v1387_v37, %v269_v38 }
 0x456   :  { %273 = vrot.lane.b32.xlu0 %v271_v39, %s1587_s24 }
 0x4c8   :  { %v274_v41 = vpop.permute.xlu0 %273 }
 0x4c9   :  { %v276_v42 = vadd.f32 %v274_v41, %v266_v40  ;;  %v601_v41 = vld [vmem:[#allocation3 + $0x28] sm:$0xff] }
 0x4cb   :  { %1388 = vtanh.f32 %v276_v42 }
 0x4d5   :  { %v1389_v43 = vpop.eup %1388 }
 0x4d6   :  { %279 = vrot.lane.b32.xlu1 %v1389_v43, %s1586_s4 }
 0x548   :  { %v280_v44 = vpop.permute.xlu1 %279 }
 0x549   :  { %v282_v45 = vmul.f32 %v1387_v37, %v280_v44 }
 0x54b   :  { %284 = vrot.lane.b32.xlu0 %v282_v45, %s1587_s24 }
 0x5bd   :  { %v285_v46 = vpop.permute.xlu0 %284 }
 0x5be   :  { %287 = vst.msk [vmem:[#allocation2 + $0x8] sm:$0xff] %vm76_vm1, %v285_v46  ;;  %1227 = vmatmul.mubr.msk.f32.vlgmr.msra.gmra.mrb[0].mxu0 %vm76_vm1, %v285_v46 }
 0x5bf   :  { %1330 = vmatpush3.bf16.msra.mxu0 %v1695_v5  ;;  %1248 = vmatprep.mubr.msk.f32.mxu0 %vm1584_vm0, %v1585_v1 }
 0x5c0   :  { %1331 = vmatprep.subr.bf16.mxu0 %v1583_v0 }
 0x5c3   :  { %1333 = vmatpush3.bf16.msra.mxu0 %v1698_v7 }
 0x5c4   :  { %1340 = vmatprep.subr.bf16.mxu0 %v1583_v0 }
 0x691   :  { %v358_v48 = vpop.f32.mrb[0].mxu0 }
 0x692   :  { %v362_v49 = vadd.f32 %v358_v48, %v289_v47  ;;  %v1228_v50 = vpop.f32.mrb[1].mxu0 }
 0x694   :  { %1390 = vtanh.f32 %v362_v49  ;;  %v1124_v52 = vmul.f32 -1.442695, %v362_v49 }
 0x696   :  { %1392 = vpow2.f32 %v1124_v52  ;;  %v927_v52 = vld [vmem:[#allocation8 + $0x8] sm:$0xff] }
 0x69e   :  { %v1391_v51 = vpop.eup %1390 }
 0x69f   :  { %372 = vrot.lane.b32.xlu1 %v1391_v51, %s1586_s4  ;;  %v926_v51 = vld [vmem:[#allocation8] sm:$0xff] }
 0x6a0   :  { %v1393_v53 = vpop.eup %1392 }
 0x6a1   :  { %v366_v54 = vadd.f32 1.0, %v1393_v53  ;;  %v1352_v53 = vpack.c.bf16 %v927_v52, %v926_v51 }
 0x6a3   :  { %1394 = vrcp.f32 %v366_v54 }
 0x6ad   :  { %v1395_v55 = vpop.eup %1394 }
 0x6ae   :  { %v370_v58 = vmul.f32 %v1395_v55, %v276_v42 }
 0x711   :  { %v373_v56 = vpop.permute.xlu1 %372 }
 0x712   :  { %v375_v57 = vmul.f32 %v1395_v55, %v373_v56 }
 0x714   :  { %377 = vrot.lane.b32.xlu0 %v375_v57, %s1587_s24  ;;  %v928_v57 = vld [vmem:[#allocation8 + $0x10] sm:$0xff] }
 0x786   :  { %v378_v59 = vpop.permute.xlu0 %377 }
 0x787   :  { %v380_v60 = vadd.f32 %v378_v59, %v370_v58  ;;  %v929_v58 = vld [vmem:[#allocation8 + $0x18] sm:$0xff] }
 0x788   :  { %v1356_v59 = vpack.c.bf16 %v929_v58, %v928_v57 }
 0x789   :  { %1396 = vtanh.f32 %v380_v60 }
 0x793   :  { %v1397_v61 = vpop.eup %1396 }
 0x794   :  { %383 = vrot.lane.b32.xlu1 %v1397_v61, %s1586_s4  ;;  %v918_v61 = vld [vmem:[#allocation2] sm:$0xff] }
 0x806   :  { %v384_v62 = vpop.permute.xlu1 %383 }
 0x807   :  { %v386_v63 = vmul.f32 %v1395_v55, %v384_v62  ;;  %v919_v62 = vld [vmem:[#allocation2 + $0x8] sm:$0xff] }
 0x809   :  { %388 = vrot.lane.b32.xlu0 %v386_v63, %s1587_s24 }
 0x87b   :  { %v389_v2 = vpop.permute.xlu0 %388 }
 0x87c   :  { %391 = vst.msk [vmem:[#allocation2 + $0x10] sm:$0xff] %vm76_vm1, %v389_v2  ;;  %1238 = vmatmul.mubr.msk.f32.vlgmr.msra.gmra.mrb[4].mxu1 %vm76_vm1, %v389_v2 }
 0x87d   :  { %1336 = vmatpush3.bf16.msra.mxu1 %v1695_v5  ;;  %1259 = vmatprep.mubr.msk.f32.mxu1 %vm1584_vm0, %v1585_v1 }
 0x87e   :  { %1337 = vmatprep.subr.bf16.mxu1 %v1583_v0 }
 0x881   :  { %1339 = vmatpush3.bf16.msra.mxu1 %v1698_v7 }
 0x882   :  { %1346 = vmatprep.subr.bf16.mxu1 %v1583_v0 }
 0x883   :  { %v920_v63 = vld [vmem:[#allocation2 + $0x10] sm:$0xff] }
 0x94f   :  { %v462_v4 = vpop.f32.mrb[4].mxu1 }
 0x950   :  { %v466_v6 = vadd.f32 %v462_v4, %v393_v3  ;;  %v1239_v8 = vpop.f32.mrb[5].mxu1 }
 0x952   :  { %1398 = vtanh.f32 %v466_v6  ;;  %v1126_v10 = vmul.f32 -1.442695, %v466_v6  ;;  %v705_v6 = vld [vmem:[#allocation3 + $0x30] sm:$0xff] }
 0x954   :  { %1400 = vpow2.f32 %v1126_v10 }
 0x95c   :  { %v1399_v9 = vpop.eup %1398 }
 0x95d   :  { %476 = vrot.lane.b32.xlu1 %v1399_v9, %s1586_s4 }
 0x95e   :  { %v1401_v11 = vpop.eup %1400 }
 0x95f   :  { %v470_v12 = vadd.f32 1.0, %v1401_v11  ;;  %v1797_v11 = vld [vmem:[%s1865_s3] ss:$0 sm:$0xff]  ;;  %s1588_s3 = smov 96  }
 0x961   :  { %1402 = vrcp.f32 %v470_v12 }
 0x96b   :  { %v1403_v13 = vpop.eup %1402 }
 0x96c   :  { %v474_v16 = vmul.f32 %v1403_v13, %v380_v60 }
 0x9cf   :  { %v477_v14 = vpop.permute.xlu1 %476 }
 0x9d0   :  { %v479_v15 = vmul.f32 %v1403_v13, %v477_v14 }
 0x9d2   :  { %481 = vrot.lane.b32.xlu0 %v479_v15, %s1587_s24 }
 0xa44   :  { %v482_v17 = vpop.permute.xlu0 %481 }
 0xa45   :  { %v484_v18 = vadd.f32 %v482_v17, %v474_v16 }
 0xa47   :  { %1404 = vtanh.f32 %v484_v18 }
 0xa51   :  { %v1405_v19 = vpop.eup %1404 }
 0xa52   :  { %487 = vrot.lane.b32.xlu1 %v1405_v19, %s1586_s4 }
 0xac4   :  { %v488_v20 = vpop.permute.xlu1 %487 }
 0xac5   :  { %v490_v21 = vmul.f32 %v1403_v13, %v488_v20 }
 0xac7   :  { %492 = vrot.lane.b32.xlu0 %v490_v21, %s1587_s24 }
 0xb39   :  { %v493_v22 = vpop.permute.xlu0 %492 }
 0xb3a   :  { %495 = vst.msk [vmem:[#allocation2 + $0x18] sm:$0xff] %vm76_vm1, %v493_v22  ;;  %1249 = vmatmul.mubr.msk.f32.vlgmr.msra.gmra.mrb[2].mxu0 %vm76_vm1, %v493_v22 }
 0xb3b   :  { %1342 = vmatpush3.bf16.msra.mxu0 %v1695_v5  ;;  %1270 = vmatprep.mubr.msk.f32.mxu0 %vm1584_vm0, %v1585_v1 }
 0xb3c   :  { %1343 = vmatprep.subr.bf16.mxu0 %v1583_v0 }
 0xb3f   :  { %1345 = vmatpush3.bf16.msra.mxu0 %v1698_v7 }
 0xb40   :  { %1353 = vmatprep.subr.bf16.mxu0 %v1352_v53 }
 0xb41   :  { %v921_v2 = vld [vmem:[#allocation2 + $0x18] sm:$0xff] }
 0xc0d   :  { %v566_v24 = vpop.f32.mrb[2].mxu0 }
 0xc0e   :  { %v570_v25 = vadd.f32 %v566_v24, %v497_v23  ;;  %v1250_v26 = vpop.f32.mrb[3].mxu0 }
 0xc10   :  { %1406 = vtanh.f32 %v570_v25  ;;  %v1128_v28 = vmul.f32 -1.442695, %v570_v25 }
 0xc12   :  { %1408 = vpow2.f32 %v1128_v28 }
 0xc1a   :  { %v1407_v27 = vpop.eup %1406 }
 0xc1b   :  { %580 = vrot.lane.b32.xlu1 %v1407_v27, %s1586_s4 }
 0xc1c   :  { %v1409_v29 = vpop.eup %1408 }
 0xc1d   :  { %v574_v30 = vadd.f32 1.0, %v1409_v29 }
 0xc1f   :  { %1410 = vrcp.f32 %v574_v30 }
 0xc29   :  { %v1411_v31 = vpop.eup %1410 }
 0xc2a   :  { %v578_v34 = vmul.f32 %v1411_v31, %v484_v18 }
 0xc8d   :  { %v581_v32 = vpop.permute.xlu1 %580 }
 0xc8e   :  { %v583_v33 = vmul.f32 %v1411_v31, %v581_v32 }
 0xc90   :  { %585 = vrot.lane.b32.xlu0 %v583_v33, %s1587_s24 }
 0xd02   :  { %v586_v35 = vpop.permute.xlu0 %585 }
 0xd03   :  { %v588_v36 = vadd.f32 %v586_v35, %v578_v34 }
 0xd05   :  { %1412 = vtanh.f32 %v588_v36 }
 0xd0f   :  { %v1413_v37 = vpop.eup %1412 }
 0xd10   :  { %591 = vrot.lane.b32.xlu1 %v1413_v37, %s1586_s4 }
 0xd82   :  { %v592_v38 = vpop.permute.xlu1 %591 }
 0xd83   :  { %v594_v39 = vmul.f32 %v1411_v31, %v592_v38 }
 0xd85   :  { %596 = vrot.lane.b32.xlu0 %v594_v39, %s1587_s24  ;;  %v809_v39 = vld [vmem:[#allocation3 + $0x38] sm:$0xff] }
 0xdf7   :  { %v597_v40 = vpop.permute.xlu0 %596 }
 0xdf8   :  { %599 = vst.msk [vmem:[#allocation2 + $0x20] sm:$0xff] %vm76_vm1, %v597_v40  ;;  %1260 = vmatmul.mubr.msk.f32.vlgmr.msra.gmra.mrb[6].mxu1 %vm76_vm1, %v597_v40 }
 0xdf9   :  { %1348 = vmatpush3.bf16.msra.mxu1 %v1695_v5  ;;  %1281 = vmatprep.mubr.msk.f32.mxu1 %vm1584_vm0, %v1585_v1 }
 0xdfa   :  { %1349 = vmatprep.subr.bf16.mxu1 %v1583_v0 }
 0xdfd   :  { %1351 = vmatpush3.bf16.msra.mxu1 %v1698_v7 }
 0xdff   :  { %v922_v3 = vld [vmem:[#allocation2 + $0x20] sm:$0xff] }
 0xecb   :  { %v670_v42 = vpop.f32.mrb[6].mxu1 }
 0xecc   :  { %v674_v43 = vadd.f32 %v670_v42, %v601_v41  ;;  %v1261_v44 = vpop.f32.mrb[7].mxu1 }
 0xece   :  { %1414 = vtanh.f32 %v674_v43  ;;  %v1130_v46 = vmul.f32 -1.442695, %v674_v43 }
 0xed0   :  { %1416 = vpow2.f32 %v1130_v46 }
 0xed8   :  { %v1415_v45 = vpop.eup %1414 }
 0xed9   :  { %684 = vrot.lane.b32.xlu1 %v1415_v45, %s1586_s4 }
 0xeda   :  { %v1417_v47 = vpop.eup %1416 }
 0xedb   :  { %v678_v48 = vadd.f32 1.0, %v1417_v47 }
 0xedd   :  { %1418 = vrcp.f32 %v678_v48 }
 0xee7   :  { %v1419_v5 = vpop.eup %1418 }
 0xee8   :  { %v682_v0 = vmul.f32 %v1419_v5, %v588_v36 }
 0xf4b   :  { %v685_v49 = vpop.permute.xlu1 %684 }
 0xf4c   :  { %v687_v1 = vmul.f32 %v1419_v5, %v685_v49 }
 0xf4e   :  { %689 = vrot.lane.b32.xlu0 %v687_v1, %s1587_s24 }
 0xfc0   :  { %v690_v7 = vpop.permute.xlu0 %689 }
 0xfc1   :  { %v1781_v50 = vadd.f32 %v690_v7, %v682_v0 }
 0xfc3   :  { %1420 = vtanh.f32 %v1781_v50 }
 0xfcd   :  { %v1421_v54 = vpop.eup %1420 }
 0xfce   :  { %695 = vrot.lane.b32.xlu1 %v1421_v54, %s1586_s4 }
0x1040   :  { %v696_v55 = vpop.permute.xlu1 %695 }
0x1041   :  { %v698_v56 = vmul.f32 %v1419_v5, %v696_v55 }
0x1043   :  { %700 = vrot.lane.b32.xlu0 %v698_v56, %s1587_s24 }
0x10b5   :  { %v701_v60 = vpop.permute.xlu0 %700 }
0x10b6   :  { %703 = vst.msk [vmem:[#allocation2 + $0x28] sm:$0xff] %vm76_vm1, %v701_v60  ;;  %1271 = vmatmul.mubr.msk.f32.vlgmr.msra.gmra.mrb[4].mxu0 %vm76_vm1, %v701_v60 }
0x10b7   :  { %1355 = vmatpush3.bf16.msra.mxu0 %v1352_v53  ;;  %1292 = vmatprep.mubr.msk.f32.mxu0 %vm76_vm1, %v918_v61 }
0x10b8   :  { %1357 = vmatprep.subr.bf16.mxu0 %v1356_v59 }
0x10bb   :  { %1359 = vmatpush3.bf16.msra.mxu0 %v1356_v59 }
0x10bd   :  { %v923_v4 = vld [vmem:[#allocation2 + $0x28] sm:$0xff] }
0x10be   :  { %1293 = vmatmul.mubr.msk.f32.vlgmr.msra.gmra.mrb[6].mxu0 %vm76_vm1, %v919_v62 }
0x10bf   :  { %1295 = vmatprep.mubr.msk.f32.mxu0 %vm76_vm1, %v920_v63 }
0x10c2   :  { %1296 = vmatmul.mubr.msk.f32.gmra.mrb[8].mxu0 %vm76_vm1, %v921_v2 }
0x10c3   :  { %1298 = vmatprep.mubr.msk.f32.mxu0 %vm76_vm1, %v922_v3 }
0x10c6   :  { %1299 = vmatmul.mubr.msk.f32.gmra.mrb[10].mxu0 %vm76_vm1, %v923_v4 }
0x1189   :  { %v774_v8 = vpop.f32.mrb[4].mxu0 }
0x118a   :  { %v778_v9 = vadd.f32 %v774_v8, %v705_v6  ;;  %v1272_v10 = vpop.f32.mrb[5].mxu0 }
0x118c   :  { %1422 = vtanh.f32 %v778_v9  ;;  %v1132_v25 = vmul.f32 -1.442695, %v778_v9 }
0x118e   :  { %1424 = vpow2.f32 %v1132_v25 }
0x1191   :  { %v1294_v12 = vpop.f32.mrb[6].mxu0 }
0x1192   :  { %v1033_v13 = vadd.f32 %v1294_v12, %v1797_v11  ;;  %v1027_v14 = vpop.f32.mrb[7].mxu0 }
0x1193   :  { %v1028_v15 = vadd.f32 %v1797_v11, %v1027_v14 }
0x1194   :  { %1067 = vst [vmem:[#allocation9 + $0x8] sm:$0xff] %v1033_v13 }
0x1195   :  { %1066 = vst [vmem:[#allocation9] sm:$0xff] %v1028_v15  ;;  %v1297_v16 = vpop.f32.mrb[8].mxu0 }
0x1196   :  { %v1423_v17 = vpop.eup %1422  ;;  %v1043_v18 = vadd.f32 %v1297_v16, %v1797_v11  ;;  %v1037_v19 = vpop.f32.mrb[9].mxu0 }
0x1197   :  { %v1038_v20 = vadd.f32 %v1797_v11, %v1037_v19  ;;  %788 = vrot.lane.b32.xlu1 %v1423_v17, %s1586_s4 }
0x1198   :  { %1069 = vst [vmem:[#allocation9 + $0x18] sm:$0xff] %v1043_v18  ;;  %v1425_v26 = vpop.eup %1424 }
0x1199   :  { %1068 = vst [vmem:[#allocation9 + $0x10] sm:$0xff] %v1038_v20  ;;  %v1300_v21 = vpop.f32.mrb[10].mxu0  ;;  %v782_v27 = vadd.f32 1.0, %v1425_v26 }
0x119a   :  { %v1053_v22 = vadd.f32 %v1300_v21, %v1797_v11  ;;  %v1047_v23 = vpop.f32.mrb[11].mxu0 }
0x119b   :  { %v1048_v24 = vadd.f32 %v1797_v11, %v1047_v23  ;;  %1426 = vrcp.f32 %v782_v27 }
0x119c   :  { %1071 = vst [vmem:[#allocation9 + $0x28] sm:$0xff] %v1053_v22 }
0x119d   :  { %1070 = vst [vmem:[#allocation9 + $0x20] sm:$0xff] %v1048_v24 }
0x11a5   :  { %v1427_v28 = vpop.eup %1426 }
0x11a6   :  { %v786_v31 = vmul.f32 %v1427_v28, %v1781_v50 }
0x1209   :  { %v789_v29 = vpop.permute.xlu1 %788 }
0x120a   :  { %v791_v30 = vmul.f32 %v1427_v28, %v789_v29 }
0x120c   :  { %793 = vrot.lane.b32.xlu0 %v791_v30, %s1587_s24 }
0x127e   :  { %v794_v32 = vpop.permute.xlu0 %793 }
0x127f   :  { %v796_v33 = vadd.f32 %v794_v32, %v786_v31 }
0x1281   :  { %1428 = vtanh.f32 %v796_v33 }
0x128b   :  { %v1429_v34 = vpop.eup %1428 }
0x128c   :  { %799 = vrot.lane.b32.xlu1 %v1429_v34, %s1586_s4 }
0x12fe   :  { %v800_v35 = vpop.permute.xlu1 %799 }
0x12ff   :  { %v802_v36 = vmul.f32 %v1427_v28, %v800_v35 }
0x1301   :  { %804 = vrot.lane.b32.xlu0 %v802_v36, %s1587_s24 }
0x1373   :  { %v805_v37 = vpop.permute.xlu0 %804 }
0x1374   :  { %807 = vst.msk [vmem:[#allocation2 + $0x30] sm:$0xff] %vm76_vm1, %v805_v37  ;;  %1282 = vmatmul.mubr.msk.f32.vlgmr.msra.gmra.mrb[8].mxu1 %vm76_vm1, %v805_v37 }
0x137b   :  { %v924_v38 = vld [vmem:[#allocation2 + $0x30] sm:$0xff] }
0x137c   :  { %1301 = vmatprep.mubr.msk.f32.mxu0 %vm76_vm1, %v924_v38 }
0x1447   :  { %v878_v40 = vpop.f32.mrb[8].mxu1 }
0x1448   :  { %v882_v41 = vadd.f32 %v878_v40, %v809_v39  ;;  %v1283_v42 = vpop.f32.mrb[9].mxu1 }
0x144a   :  { %1430 = vtanh.f32 %v882_v41  ;;  %v1134_v44 = vmul.f32 -1.442695, %v882_v41 }
0x144c   :  { %1432 = vpow2.f32 %v1134_v44 }
0x1454   :  { %v1431_v43 = vpop.eup %1430 }
0x1455   :  { %892 = vrot.lane.b32.xlu1 %v1431_v43, %s1586_s4 }
0x1456   :  { %v1433_v45 = vpop.eup %1432 }
0x1457   :  { %v886_v46 = vadd.f32 1.0, %v1433_v45 }
0x1459   :  { %1434 = vrcp.f32 %v886_v46 }
0x1463   :  { %v1435_v47 = vpop.eup %1434 }
0x1464   :  { %v890_v49 = vmul.f32 %v1435_v47, %v796_v33 }
0x14c7   :  { %v893_v48 = vpop.permute.xlu1 %892 }
0x14c8   :  { %v895_v5 = vmul.f32 %v1435_v47, %v893_v48 }
0x14ca   :  { %897 = vrot.lane.b32.xlu0 %v895_v5, %s1587_s24 }
0x153c   :  { %v898_v1 = vpop.permute.xlu0 %897 }
0x153d   :  { %v900_v0 = vadd.f32 %v898_v1, %v890_v49 }
0x153f   :  { %1436 = vtanh.f32 %v900_v0 }
0x1549   :  { %v1437_v7 = vpop.eup %1436 }
0x154a   :  { %903 = vrot.lane.b32.xlu1 %v1437_v7, %s1586_s4 }
0x154e   :  { %914 = vrot.lane.b32.xlu1 %v900_v0, %s1588_s3 }
0x15bc   :  { %v904_v50 = vpop.permute.xlu1 %903 }
0x15bd   :  { %v906_v51 = vmul.f32 %v1435_v47, %v904_v50 }
0x15bf   :  { %908 = vrot.lane.b32.xlu0 %v906_v51, %s1587_s24 }
0x15c0   :  { %v915_v52 = vpop.permute.xlu1 %914 }
0x15c1   :  { %917 = vst.msk [vmem:[#allocation12] sm:$0xff] %vm76_vm1, %v915_v52 }
0x1631   :  { %v909_v53 = vpop.permute.xlu0 %908 }
0x1632   :  { %911 = vst.msk [vmem:[#allocation2 + $0x38] sm:$0xff] %vm76_vm1, %v909_v53  ;;  %912 = vst.msk [vmem:[#allocation10] sm:$0xff] %vm76_vm1, %v909_v53 }
0x1639   :  { %v925_v54 = vld [vmem:[#allocation2 + $0x38] sm:$0xff] }
0x163a   :  { %1302 = vmatmul.mubr.msk.f32.gmra.mrb[12].mxu0 %vm76_vm1, %v925_v54 }
0x163b   :  { %1515 = shalt.err (!%p1512_p0)
}
0x163c   :  { %s1516_s9 = scalar_lea.hbm %s1869_s7, 128 }
0x163d   :  { %p1517_p1 = scmp.ne.s32.totalorder %s1869_s7, %s1516_s9  ;;  %p1520_p2 = scmp.lt.u32.totalorder %s1516_s9, %s1869_s7 }
0x163f   :  { %p1522_p3 = pnand %p1520_p2, %p1517_p1 }
0x1641   :  { %1525 = shalt.err (!%p1522_p3)
}
0x1642   :  { %1095 = dma.vmem_to_hbm [thread:$0]  %s1093_s27, 128, %s1869_s7, [#allocation11]  }
0x1643   :  { %s1590_s16 = smov [#allocation12]  }
0x1644   :  { %s1102_s19 = sshll.u32 %s1590_s16, 4  ;;  %s1103_s19 = int_to_ptr.vmem [resolvable:$true] %s1102_s19 }
0x1645   :  { %s1526_s20 = scalar_lea.vmem %s1103_s19, 128  ;;  %p1531_p5 = scmp.lt.s32.totalorder %s1103_s19, %s1103_s19 }
0x1646   :  { %p1527_p4 = scmp.ne.s32.totalorder %s1103_s19, %s1526_s20  ;;  %p1532_p6 = scmp.lt.s32.totalorder %s1526_s20, %s1526_s20 }
0x1648   :  { %p1533_p7 = por %p1532_p6, %p1531_p5 }
0x164a   :  { %p1534_p8 = pnand %p1533_p7, %p1527_p4 }
0x164c   :  { %1537 = shalt.err (!%p1534_p8)
}
0x164d   :  { %s1538_s2 = scalar_lea.hbm %s1870_s8, 128 }
0x164e   :  { %p1539_p9 = scmp.ne.s32.totalorder %s1870_s8, %s1538_s2  ;;  %p1542_p10 = scmp.lt.u32.totalorder %s1538_s2, %s1870_s8 }
0x1650   :  { %p1544_p11 = pnand %p1542_p10, %p1539_p9 }
0x1652   :  { %1547 = shalt.err (!%p1544_p11)
}
0x1653   :  { %1105 = dma.vmem_to_hbm [thread:$0]  %s1103_s19, 128, %s1870_s8, [#allocation11]  }
0x1654   :  { %s1591_s5 = smov [#allocation9]  }
0x1655   :  { %s1079_s25 = sshll.u32 %s1591_s5, 4  ;;  %s1080_s25 = int_to_ptr.vmem [resolvable:$true] %s1079_s25 }
0x1656   :  { %s1548_s3 = scalar_lea.vmem %s1080_s25, 1024  ;;  %p1553_p13 = scmp.lt.s32.totalorder %s1080_s25, %s1080_s25 }
0x1657   :  { %p1549_p12 = scmp.ne.s32.totalorder %s1080_s25, %s1548_s3  ;;  %p1554_p0 = scmp.lt.s32.totalorder %s1548_s3, %s1548_s3 }
0x1659   :  { %p1555_p1 = por %p1554_p0, %p1553_p13 }
0x165b   :  { %p1556_p2 = pnand %p1555_p1, %p1549_p12 }
0x170d   :  { %v1303_v55 = vpop.f32.mrb[12].mxu0 }
0x170e   :  { %v1063_v56 = vadd.f32 %v1303_v55, %v1797_v11  ;;  %v1057_v57 = vpop.f32.mrb[13].mxu0 }
0x170f   :  { %v1058_v58 = vadd.f32 %v1797_v11, %v1057_v57 }
0x1710   :  { %1073 = vst [vmem:[#allocation9 + $0x38] sm:$0xff] %v1063_v56 }
0x1711   :  { %1072 = vst [vmem:[#allocation9 + $0x30] sm:$0xff] %v1058_v58 }
0x1712   :  { %1559 = shalt.err (!%p1556_p2)
}
0x1713   :  { %s1560_s27 = scalar_lea.hbm %s1868_s6, 1024 }
0x1714   :  { %p1561_p3 = scmp.ne.s32.totalorder %s1868_s6, %s1560_s27  ;;  %p1564_p4 = scmp.lt.u32.totalorder %s1560_s27, %s1868_s6 }
0x1716   :  { %p1566_p5 = pnand %p1564_p4, %p1561_p3 }
0x1718   :  { %1569 = shalt.err (!%p1566_p5)
}
0x1719   :  { %1085 = dma.vmem_to_hbm [thread:$0]  %s1080_s25, 1024, %s1868_s6, [#allocation5], %s1580_s17, %s1580_s17, %s1581_s18  }
0x171a   :  { %1574 = dma.done.wait [#allocation5], 1024  }
0x171b   :  { %1575 = vsyncadd [#allocation5], 4294966272 }
0x171c   :  { %1576 = dma.done.wait [#allocation11], 256  }
0x171d   :  { %1577 = vsyncadd [#allocation11], 4294967040 }
0x171e   :  { %1115 = vsyncpa [#allocation4], 1 }
0x171f   :  { %1116 = vsyncpa [#allocation7], 1 }
0x1720   :  { %1117 = vsyncpa [#allocation5], 1 }
0x1721   :  { %1118 = vsyncpa [#allocation11], 1 }

</bundles_post_ra>
